<compile_context>
chip_gen: v7x
topology: tpu7x:2x2x1
jax: 0.10.0
libtpu: 0.0.40
codegen_flags: <defaults>
</compile_context>

<pallas_src>
import jax
import jax.numpy as jnp
from jax.experimental import pallas as pl
from jax.experimental.pallas import tpu as pltpu


def _asp_kernel(x_ref, w1x_ref, b1_ref, w2_ref, b2_ref, out_ref,
                m_acc, l_acc, ex_acc, ex2_acc):
    t_idx = pl.program_id(1)

    @pl.when(t_idx == 0)
    def _init():
        m_acc[...] = jnp.full_like(m_acc, -jnp.inf)
        l_acc[...] = jnp.zeros_like(l_acc)
        ex_acc[...] = jnp.zeros_like(ex_acc)
        ex2_acc[...] = jnp.zeros_like(ex2_acc)

    x = x_ref[0]                                            # (tT, C), f32, C on lanes

    # Attention scores for this T tile; T is the MXU M dimension.
    h = jnp.tanh(jnp.dot(x, w1x_ref[...], preferred_element_type=jnp.float32)
                 + b1_ref[0])                               # (tT, A)
    s = (jnp.dot(h, w2_ref[...], preferred_element_type=jnp.float32)
         + b2_ref[...])                                     # (tT, C)

    # Online softmax over T (axis 0 / sublanes), normalization deferred.
    tile_max = jnp.max(s, axis=0, keepdims=True)            # (1, C)
    m_new = jnp.maximum(m_acc[...], tile_max)
    corr = jnp.exp(m_acc[...] - m_new)                      # (1, C)
    e = jnp.exp(s - m_new)                                  # (tT, C)
    ex = e * x                                              # reused for mean and msq
    l_acc[...] = corr * l_acc[...] + jnp.sum(e, axis=0, keepdims=True)
    ex_acc[...] = corr * ex_acc[...] + jnp.sum(ex, axis=0, keepdims=True)
    ex2_acc[...] = corr * ex2_acc[...] + jnp.sum(ex * x, axis=0, keepdims=True)
    m_acc[...] = m_new

    @pl.when(t_idx == pl.num_programs(1) - 1)
    def _finalize():
        denom = l_acc[...]
        inv = pl.reciprocal(denom, approx=True)
        inv = inv * (2.0 - denom * inv)                     # one Newton step -> ~f32 exact
        mean = ex_acc[...] * inv                            # (1, C)
        msq = ex2_acc[...] * inv                            # (1, C)
        std = jnp.sqrt(jnp.maximum(msq - mean * mean, 1e-9))
        out_ref[0] = jnp.concatenate([mean, std], axis=0)   # (2, C) lane-dense store


def _pick_t_tile(T, target=512):
    """Largest T tile <= target that divides T and is a multiple of 8 (else whole T)."""
    if T <= target:
        return T
    tt = target - (target % 8)
    while tt >= 8:
        if T % tt == 0:
            return tt
        tt -= 8
    return T


def attentive_stats_pool(x, w1, b1, w2, b2, *, global_context_att=False, t_tile=None):
    """x: (B, C, T) f32; w1: (A, C) or (A, 3C); b1: (A,); w2: (C, A); b2: (C,).
    Returns (B, 2*C) = concat([mean, std], axis=1), matching the PyTorch module."""
    B, C, T = x.shape
    A = w1.shape[0]

    if t_tile is None:
        t_tile = _pick_t_tile(T)
    if t_tile != T:
        assert T % t_tile == 0 and t_tile % 8 == 0, "t_tile must divide T and be a multiple of 8"
    n_t = T // t_tile

    # Layout plumbing: T becomes the MXU M dim, C becomes the 128-lane axis.
    x_t = jnp.swapaxes(x, 1, 2)                             # (B, T, C)

    if global_context_att:
        assert w1.shape[1] == 3 * C
        w1x, w1m, w1s = w1[:, :C], w1[:, C:2 * C], w1[:, 2 * C:]
        # TODO(synk): the context mean/std need a full pass over T before the attention
        # matmul; they are tiny (B, C) stats, so they are computed here with plain XLA
        # ops and folded into a per-batch bias instead of materializing the (3C, T) concat.
        ctx_mean = jnp.mean(x, axis=-1)                                        # (B, C)
        ctx_var = jnp.sum((x - ctx_mean[..., None]) ** 2, axis=-1) / (T - 1)   # unbiased (torch.var)
        ctx_std = jnp.sqrt(ctx_var + 1e-10)                                    # (B, C)
        b1_eff = b1[None, :] + ctx_mean @ w1m.T + ctx_std @ w1s.T              # (B, A)
    else:
        assert w1.shape[1] == C
        w1x = w1
        b1_eff = jnp.broadcast_to(b1[None, :], (B, A))

    w1x_t = w1x.T                      # (C, A)
    w2_t = w2.T                        # (A, C)
    b1_eff = b1_eff.reshape(B, 1, A)
    b2_row = b2.reshape(1, C)

    # VMEM budget (explicit, so v7x's 64 MiB is respected at production shapes).
    est_bytes = 4 * (
        2 * t_tile * C                       # x tile, double-buffered
        + 2 * (C * A + A * C + A + 3 * C)    # weights / biases / out block
        + 4 * C                              # online-softmax accumulators
        + t_tile * (A + 3 * C)               # h, s/e, e*x intermediates
    )
    vmem_limit = int(min(max(2 * est_bytes, 16 * 1024 * 1024), 64 * 1024 * 1024))

    cost = pl.CostEstimate(
        flops=2 * B * T * (C * A + A * C) + 8 * B * T * C,
        transcendentals=B * T * (A + C),
        bytes_accessed=4 * (B * T * C + C * A + A * C + B * A + C + 2 * B * C),
    )

    out = pl.pallas_call(
        _asp_kernel,
        out_shape=jax.ShapeDtypeStruct((B, 2, C), jnp.float32),
        grid_spec=pltpu.PrefetchScalarGridSpec(
            num_scalar_prefetch=0,
            grid=(B, n_t),
            in_specs=[
                pl.BlockSpec((1, t_tile, C), lambda b, t: (b, t, 0)),   # x tile
                pl.BlockSpec((C, A), lambda b, t: (0, 0)),              # W1_x^T
                pl.BlockSpec((1, 1, A), lambda b, t: (b, 0, 0)),        # per-batch bias1
                pl.BlockSpec((A, C), lambda b, t: (0, 0)),              # W2^T
                pl.BlockSpec((1, C), lambda b, t: (0, 0)),              # bias2
            ],
            out_specs=pl.BlockSpec((1, 2, C), lambda b, t: (b, 0, 0)),
            scratch_shapes=[pltpu.VMEM((1, C), jnp.float32)] * 4,       # m, l, sum(e*x), sum(e*x^2)
        ),
        compiler_params=pltpu.CompilerParams(
            dimension_semantics=("parallel", "arbitrary"),
            vmem_limit_bytes=vmem_limit,
        ),
        cost_estimate=cost,
    )(x_t, w1x_t, b1_eff, w2_t, b2_row)

    # (B, 2, C) -> (B, 2C): first C = mean, next C = std (matches torch.cat([mean, std], 1)).
    return out.reshape(B, 2 * C)


def _reference(x, w1, b1, w2, b2, *, global_context_att=False):
    """Pure-JAX reference mirroring the PyTorch forward."""
    if global_context_att:
        T = x.shape[-1]
        cm = jnp.mean(x, axis=-1, keepdims=True)
        cv = jnp.sum((x - cm) ** 2, axis=-1, keepdims=True) / (T - 1)
        cs = jnp.sqrt(cv + 1e-10)
        x_in = jnp.concatenate(
            [x, jnp.broadcast_to(cm, x.shape), jnp.broadcast_to(cs, x.shape)], axis=1)
    else:
        x_in = x
    h = jnp.tanh(jnp.einsum("ac,bct->bat", w1, x_in) + b1[None, :, None])
    s = jnp.einsum("ca,bat->bct", w2, h) + b2[None, :, None]
    alpha = jax.nn.softmax(s, axis=2)
    mean = jnp.sum(alpha * x, axis=2)
    resid = jnp.sum(alpha * x ** 2, axis=2) - mean ** 2
    std = jnp.sqrt(jnp.maximum(resid, 1e-9))
    return jnp.concatenate([mean, std], axis=1)


if __name__ == "__main__":
    # Small forward-consistent shapes: batch=2, in_dim=16, attention_channels=32, T=64.
    # t_tile=32 forces 2 T-tiles so the online-softmax accumulation path is exercised.
    B, C, A, T = 2, 16, 32, 64

    key = jax.random.PRNGKey(0)
    kx, kw1, kb1, kw2, kb2, kw1g, kb1g = jax.random.split(key, 7)

    x = jax.random.normal(kx, (B, C, T), dtype=jnp.float32)

    w1 = jax.random.normal(kw1, (A, C), dtype=jnp.float32) * (1.0 / jnp.sqrt(C))
    b1 = jax.random.normal(kb1, (A,), dtype=jnp.float32) * 0.01
    w2 = jax.random.normal(kw2, (C, A), dtype=jnp.float32) * (1.0 / jnp.sqrt(A))
    b2 = jax.random.normal(kb2, (C,), dtype=jnp.float32) * 0.01

    # Path 1: global_context_att=False
    out = attentive_stats_pool(x, w1, b1, w2, b2, global_context_att=False, t_tile=32)
    out = jax.block_until_ready(out)
    ref = _reference(x, w1, b1, w2, b2, global_context_att=False)
    assert out.shape == (B, 2 * C)
    assert jnp.allclose(out, ref, atol=1e-4, rtol=1e-4), "mismatch vs reference (plain)"

    # Path 2: global_context_att=True (W1 has 3C input columns)
    w1g = jax.random.normal(kw1g, (A, 3 * C), dtype=jnp.float32) * (1.0 / jnp.sqrt(3 * C))
    b1g = jax.random.normal(kb1g, (A,), dtype=jnp.float32) * 0.01
    outg = attentive_stats_pool(x, w1g, b1g, w2, b2, global_context_att=True, t_tile=32)
    outg = jax.block_until_ready(outg)
    refg = _reference(x, w1g, b1g, w2, b2, global_context_att=True)
    assert outg.shape == (B, 2 * C)
    assert jnp.allclose(outg, refg, atol=1e-4, rtol=1e-4), "mismatch vs reference (global ctx)"

    print("KERNEL_OK")
</pallas_src>

<mosaic_0001>
module attributes {stable_mosaic.version = 11 : i64} {
  func.func @_asp_kernel(%arg0: i32, %arg1: i32, %arg2: memref<1x32x16xf32, #tpu.memory_space<vmem>>, %arg3: memref<16x32xf32, #tpu.memory_space<vmem>>, %arg4: memref<1x1x32xf32, #tpu.memory_space<vmem>>, %arg5: memref<32x16xf32, #tpu.memory_space<vmem>>, %arg6: memref<1x16xf32, #tpu.memory_space<vmem>>, %arg7: memref<1x2x16xf32, #tpu.memory_space<vmem>>, %arg8: memref<1x16xf32, #tpu.memory_space<vmem>>, %arg9: memref<1x16xf32, #tpu.memory_space<vmem>>, %arg10: memref<1x16xf32, #tpu.memory_space<vmem>>, %arg11: memref<1x16xf32, #tpu.memory_space<vmem>>) attributes {dimension_semantics = [#tpu.dimension_semantics<parallel>, #tpu.dimension_semantics<arbitrary>], iteration_bounds = array<i64: 2, 2>, scalar_prefetch = 0 : i64, scratch_operands = 4 : i64, tpu.core_type = #tpu.core_type<tc>, window_params = [{transform_indices = @transform_0, window_bounds = array<i64: 1, 32, 16>}, {pipeline_mode = #tpu.pipeline_mode<synchronous>, transform_indices = @transform_1, window_bounds = array<i64: 16, 32>}, {transform_indices = @transform_2, window_bounds = array<i64: 1, 1, 32>}, {pipeline_mode = #tpu.pipeline_mode<synchronous>, transform_indices = @transform_3, window_bounds = array<i64: 32, 16>}, {pipeline_mode = #tpu.pipeline_mode<synchronous>, transform_indices = @transform_4, window_bounds = array<i64: 1, 16>}, {transform_indices = @transform_5, window_bounds = array<i64: 1, 2, 16>}]} {
    %c0_i32 = arith.constant 0 : i32
    %0 = arith.cmpi eq, %arg1, %c0_i32 : i32
    %1 = arith.extui %0 : i1 to i32
    %c0_i32_0 = arith.constant 0 : i32
    %2 = arith.cmpi ne, %1, %c0_i32_0 : i32
    scf.if %2 {
      %cst_36 = arith.constant 0xFF800000 : f32
      %51 = vector.broadcast %cst_36 : f32 to vector<1x16xf32>
      %c0_37 = arith.constant 0 : index
      %c0_38 = arith.constant 0 : index
      %52 = vector.load %arg8[%c0_37, %c0_38] : memref<1x16xf32, #tpu.memory_space<vmem>>, vector<1x16xf32>
      tpu.vector_store %arg8[%c0_37, %c0_38], %51 {strides = array<i32>} : memref<1x16xf32, #tpu.memory_space<vmem>>, vector<1x16xf32>,
      %cst_39 = arith.constant 0.000000e+00 : f32
      %53 = vector.broadcast %cst_39 : f32 to vector<1x16xf32>
      %c0_40 = arith.constant 0 : index
      %c0_41 = arith.constant 0 : index
      %54 = vector.load %arg9[%c0_40, %c0_41] : memref<1x16xf32, #tpu.memory_space<vmem>>, vector<1x16xf32>
      tpu.vector_store %arg9[%c0_40, %c0_41], %53 {strides = array<i32>} : memref<1x16xf32, #tpu.memory_space<vmem>>, vector<1x16xf32>,
      %cst_42 = arith.constant 0.000000e+00 : f32
      %55 = vector.broadcast %cst_42 : f32 to vector<1x16xf32>
      %c0_43 = arith.constant 0 : index
      %c0_44 = arith.constant 0 : index
      %56 = vector.load %arg10[%c0_43, %c0_44] : memref<1x16xf32, #tpu.memory_space<vmem>>, vector<1x16xf32>
      tpu.vector_store %arg10[%c0_43, %c0_44], %55 {strides = array<i32>} : memref<1x16xf32, #tpu.memory_space<vmem>>, vector<1x16xf32>,
      %cst_45 = arith.constant 0.000000e+00 : f32
      %57 = vector.broadcast %cst_45 : f32 to vector<1x16xf32>
      %c0_46 = arith.constant 0 : index
      %c0_47 = arith.constant 0 : index
      %58 = vector.load %arg11[%c0_46, %c0_47] : memref<1x16xf32, #tpu.memory_space<vmem>>, vector<1x16xf32>
      tpu.vector_store %arg11[%c0_46, %c0_47], %57 {strides = array<i32>} : memref<1x16xf32, #tpu.memory_space<vmem>>, vector<1x16xf32>,
    } else {
    }
    %c0 = arith.constant 0 : index
    %c0_1 = arith.constant 0 : index
    %c0_2 = arith.constant 0 : index
    %3 = vector.load %arg2[%c0, %c0_1, %c0_2] : memref<1x32x16xf32, #tpu.memory_space<vmem>>, vector<1x32x16xf32>
    %4 = vector.shape_cast %3 : vector<1x32x16xf32> to vector<32x16xf32>
    %c0_3 = arith.constant 0 : index
    %c0_4 = arith.constant 0 : index
    %5 = vector.load %arg3[%c0_3, %c0_4] : memref<16x32xf32, #tpu.memory_space<vmem>>, vector<16x32xf32>
    %cst = arith.constant dense<0.000000e+00> : vector<32x32xf32>
    %6 = tpu.matmul %4, %5, %cst {dimension_numbers = #tpu.dot_dimension_numbers<[1], [0], [0], [1], [0, 0, 1, 1], [], []>} : vector<32x16xf32>, vector<16x32xf32>, vector<32x32xf32> -> vector<32x32xf32>
    %c0_5 = arith.constant 0 : index
    %c0_6 = arith.constant 0 : index
    %c0_7 = arith.constant 0 : index
    %7 = vector.load %arg4[%c0_5, %c0_6, %c0_7] : memref<1x1x32xf32, #tpu.memory_space<vmem>>, vector<1x1x32xf32>
    %8 = vector.shape_cast %7 : vector<1x1x32xf32> to vector<1x32xf32>
    %9 = vector.broadcast %8 : vector<1x32xf32> to vector<32x32xf32>
    %10 = arith.addf %6, %9 : vector<32x32xf32>
    %11 = math.tanh %10 : vector<32x32xf32>
    %c0_8 = arith.constant 0 : index
    %c0_9 = arith.constant 0 : index
    %12 = vector.load %arg5[%c0_8, %c0_9] : memref<32x16xf32, #tpu.memory_space<vmem>>, vector<32x16xf32>
    %cst_10 = arith.constant dense<0.000000e+00> : vector<32x16xf32>
    %13 = tpu.matmul %11, %12, %cst_10 {dimension_numbers = #tpu.dot_dimension_numbers<[1], [0], [0], [1], [0, 0, 1, 1], [], []>} : vector<32x32xf32>, vector<32x16xf32>, vector<32x16xf32> -> vector<32x16xf32>
    %c0_11 = arith.constant 0 : index
    %c0_12 = arith.constant 0 : index
    %14 = vector.load %arg6[%c0_11, %c0_12] : memref<1x16xf32, #tpu.memory_space<vmem>>, vector<1x16xf32>
    %15 = vector.broadcast %14 : vector<1x16xf32> to vector<32x16xf32>
    %16 = arith.addf %13, %15 : vector<32x16xf32>
    %cst_13 = arith.constant dense<0xFF800000> : vector<16xf32>
    %17 = vector.multi_reduction <maximumf>, %16, %cst_13 [0] : vector<32x16xf32> to vector<16xf32>
    %18 = vector.shape_cast %17 : vector<16xf32> to vector<1x16xf32>
    %c0_14 = arith.constant 0 : index
    %c0_15 = arith.constant 0 : index
    %19 = vector.load %arg8[%c0_14, %c0_15] : memref<1x16xf32, #tpu.memory_space<vmem>>, vector<1x16xf32>
    %20 = arith.maximumf %19, %18 : vector<1x16xf32>
    %c0_16 = arith.constant 0 : index
    %c0_17 = arith.constant 0 : index
    %21 = vector.load %arg8[%c0_16, %c0_17] : memref<1x16xf32, #tpu.memory_space<vmem>>, vector<1x16xf32>
    %22 = arith.subf %21, %20 : vector<1x16xf32>
    %23 = math.exp %22 : vector<1x16xf32>
    %24 = vector.broadcast %20 : vector<1x16xf32> to vector<32x16xf32>
    %25 = arith.subf %16, %24 : vector<32x16xf32>
    %26 = math.exp %25 : vector<32x16xf32>
    %27 = arith.mulf %26, %4 : vector<32x16xf32>
    %c0_18 = arith.constant 0 : index
    %c0_19 = arith.constant 0 : index
    %28 = vector.load %arg9[%c0_18, %c0_19] : memref<1x16xf32, #tpu.memory_space<vmem>>, vector<1x16xf32>
    %29 = arith.mulf %23, %28 : vector<1x16xf32>
    %cst_20 = arith.constant dense<0.000000e+00> : vector<16xf32>
    %30 = vector.multi_reduction <add>, %26, %cst_20 [0] : vector<32x16xf32> to vector<16xf32>
    %31 = vector.shape_cast %30 : vector<16xf32> to vector<1x16xf32>
    %32 = arith.addf %29, %31 : vector<1x16xf32>
    %c0_21 = arith.constant 0 : index
    %c0_22 = arith.constant 0 : index
    %33 = vector.load %arg9[%c0_21, %c0_22] : memref<1x16xf32, #tpu.memory_space<vmem>>, vector<1x16xf32>
    tpu.vector_store %arg9[%c0_21, %c0_22], %32 {strides = array<i32>} : memref<1x16xf32, #tpu.memory_space<vmem>>, vector<1x16xf32>,
    %c0_23 = arith.constant 0 : index
    %c0_24 = arith.constant 0 : index
    %34 = vector.load %arg10[%c0_23, %c0_24] : memref<1x16xf32, #tpu.memory_space<vmem>>, vector<1x16xf32>
    %35 = arith.mulf %23, %34 : vector<1x16xf32>
    %cst_25 = arith.constant dense<0.000000e+00> : vector<16xf32>
    %36 = vector.multi_reduction <add>, %27, %cst_25 [0] : vector<32x16xf32> to vector<16xf32>
    %37 = vector.shape_cast %36 : vector<16xf32> to vector<1x16xf32>
    %38 = arith.addf %35, %37 : vector<1x16xf32>
    %c0_26 = arith.constant 0 : index
    %c0_27 = arith.constant 0 : index
    %39 = vector.load %arg10[%c0_26, %c0_27] : memref<1x16xf32, #tpu.memory_space<vmem>>, vector<1x16xf32>
    tpu.vector_store %arg10[%c0_26, %c0_27], %38 {strides = array<i32>} : memref<1x16xf32, #tpu.memory_space<vmem>>, vector<1x16xf32>,
    %c0_28 = arith.constant 0 : index
    %c0_29 = arith.constant 0 : index
    %40 = vector.load %arg11[%c0_28, %c0_29] : memref<1x16xf32, #tpu.memory_space<vmem>>, vector<1x16xf32>
    %41 = arith.mulf %23, %40 : vector<1x16xf32>
    %42 = arith.mulf %27, %4 : vector<32x16xf32>
    %cst_30 = arith.constant dense<0.000000e+00> : vector<16xf32>
    %43 = vector.multi_reduction <add>, %42, %cst_30 [0] : vector<32x16xf32> to vector<16xf32>
    %44 = vector.shape_cast %43 : vector<16xf32> to vector<1x16xf32>
    %45 = arith.addf %41, %44 : vector<1x16xf32>
    %c0_31 = arith.constant 0 : index
    %c0_32 = arith.constant 0 : index
    %46 = vector.load %arg11[%c0_31, %c0_32] : memref<1x16xf32, #tpu.memory_space<vmem>>, vector<1x16xf32>
    tpu.vector_store %arg11[%c0_31, %c0_32], %45 {strides = array<i32>} : memref<1x16xf32, #tpu.memory_space<vmem>>, vector<1x16xf32>,
    %c0_33 = arith.constant 0 : index
    %c0_34 = arith.constant 0 : index
    %47 = vector.load %arg8[%c0_33, %c0_34] : memref<1x16xf32, #tpu.memory_space<vmem>>, vector<1x16xf32>
    tpu.vector_store %arg8[%c0_33, %c0_34], %20 {strides = array<i32>} : memref<1x16xf32, #tpu.memory_space<vmem>>, vector<1x16xf32>,
    %c1_i32 = arith.constant 1 : i32
    %48 = arith.cmpi eq, %arg1, %c1_i32 : i32
    %49 = arith.extui %48 : i1 to i32
    %c0_i32_35 = arith.constant 0 : i32
    %50 = arith.cmpi ne, %49, %c0_i32_35 : i32
    scf.if %50 {
      %c0_36 = arith.constant 0 : index
      %c0_37 = arith.constant 0 : index
      %51 = vector.load %arg9[%c0_36, %c0_37] : memref<1x16xf32, #tpu.memory_space<vmem>>, vector<1x16xf32>
      %52 = tpu.reciprocal %51 {approx = true} : vector<1x16xf32> -> vector<1x16xf32>
      %53 = arith.mulf %51, %52 : vector<1x16xf32>
      %cst_38 = arith.constant 2.000000e+00 : f32
      %54 = vector.broadcast %cst_38 : f32 to vector<1x16xf32>
      %55 = arith.subf %54, %53 : vector<1x16xf32>
      %56 = arith.mulf %52, %55 : vector<1x16xf32>
      %c0_39 = arith.constant 0 : index
      %c0_40 = arith.constant 0 : index
      %57 = vector.load %arg10[%c0_39, %c0_40] : memref<1x16xf32, #tpu.memory_space<vmem>>, vector<1x16xf32>
      %58 = arith.mulf %57, %56 : vector<1x16xf32>
      %c0_41 = arith.constant 0 : index
      %c0_42 = arith.constant 0 : index
      %59 = vector.load %arg11[%c0_41, %c0_42] : memref<1x16xf32, #tpu.memory_space<vmem>>, vector<1x16xf32>
      %60 = arith.mulf %59, %56 : vector<1x16xf32>
      %61 = arith.mulf %58, %58 : vector<1x16xf32>
      %62 = arith.subf %60, %61 : vector<1x16xf32>
      %cst_43 = arith.constant 9.99999971E-10 : f32
      %63 = vector.broadcast %cst_43 : f32 to vector<1x16xf32>
      %64 = arith.maximumf %62, %63 : vector<1x16xf32>
      %65 = math.sqrt %64 : vector<1x16xf32>
      %66 = tpu.concatenate %58, %65 in 0 : vector<1x16xf32>, vector<1x16xf32> -> vector<2x16xf32>
      %c0_44 = arith.constant 0 : index
      %c0_45 = arith.constant 0 : index
      %c0_46 = arith.constant 0 : index
      %67 = vector.load %arg7[%c0_44, %c0_45, %c0_46] : memref<1x2x16xf32, #tpu.memory_space<vmem>>, vector<1x2x16xf32>
      %68 = vector.shape_cast %67 : vector<1x2x16xf32> to vector<2x16xf32>
      %69 = vector.shape_cast %66 : vector<2x16xf32> to vector<1x2x16xf32>
      tpu.vector_store %arg7[%c0_44, %c0_45, %c0_46], %69 {strides = array<i32>} : memref<1x2x16xf32, #tpu.memory_space<vmem>>, vector<1x2x16xf32>,
    } else {
    }
    return
  }
  func.func @transform_0(%arg0: i32, %arg1: i32) -> (i32, i32, i32) {
    %c0_i32 = arith.constant 0 : i32
    %c0_i32_0 = arith.constant 0 : i32
    return %arg0, %arg1, %c0_i32 : i32, i32, i32
  }
  func.func @transform_1(%arg0: i32, %arg1: i32) -> (i32, i32) {
    %c0_i32 = arith.constant 0 : i32
    %c0_i32_0 = arith.constant 0 : i32
    %c0_i32_1 = arith.constant 0 : i32
    return %c0_i32, %c0_i32_0 : i32, i32
  }
  func.func @transform_2(%arg0: i32, %arg1: i32) -> (i32, i32, i32) {
    %c0_i32 = arith.constant 0 : i32
    %c0_i32_0 = arith.constant 0 : i32
    %c0_i32_1 = arith.constant 0 : i32
    return %arg0, %c0_i32, %c0_i32_0 : i32, i32, i32
  }
  func.func @transform_3(%arg0: i32, %arg1: i32) -> (i32, i32) {
    %c0_i32 = arith.constant 0 : i32
    %c0_i32_0 = arith.constant 0 : i32
    %c0_i32_1 = arith.constant 0 : i32
    return %c0_i32, %c0_i32_0 : i32, i32
  }
  func.func @transform_4(%arg0: i32, %arg1: i32) -> (i32, i32) {
    %c0_i32 = arith.constant 0 : i32
    %c0_i32_0 = arith.constant 0 : i32
    %c0_i32_1 = arith.constant 0 : i32
    return %c0_i32, %c0_i32_0 : i32, i32
  }
  func.func @transform_5(%arg0: i32, %arg1: i32) -> (i32, i32, i32) {
    %c0_i32 = arith.constant 0 : i32
    %c0_i32_0 = arith.constant 0 : i32
    %c0_i32_1 = arith.constant 0 : i32
    return %arg0, %c0_i32, %c0_i32_0 : i32, i32, i32
  }
}

</mosaic_0001>

<bundles_post_ra>
// kernel: tpu_custom_call.1
= control target key start
LH: loop header
LB: loop body
LE: loop exit
PB: predicated region body
PF: predicated region fallthrough
CT: control target
= control target key end

     0   :  { %10 = vsyncpa [#allocation7], 0  ;;  %s1250_s0 = inlined_call_operand.vmem [shape: f32[2,64,16], index: 0, kind: input, shape index: {}]   ;;  %s1251_s1 = inlined_call_operand.vmem [shape: f32[16,32], index: 1, kind: input, shape index: {}]   ;;  %s1252_s2 = inlined_call_operand.vmem [shape: f32[2,1,32], index: 2, kind: input, shape index: {}]   ;;  %s1253_s3 = inlined_call_operand.vmem [shape: f32[32,16], index: 3, kind: input, shape index: {}]   ;;  %s1254_s4 = inlined_call_operand.vmem [shape: f32[1,16], index: 4, kind: input, shape index: {}]   ;;  %s1255_s5 = inlined_call_operand.hbm [shape: f32[2,2,16], index: 5, kind: output, shape index: {}]  }
   0x1   :  { %12 = vsyncpa [#allocation7 + $0x1], 0  ;;  %s1026_s18 = smov 0   ;;  %s1028_s19 = smov 0  }
   0x2   :  { %s1030_s20 = smov 0   ;;  %s1032_s21 = smov 0  }
   0x3   :  { %s1034_s22 = smov 0   ;;  %s1036_s23 = smov 0  }
   0x4   :  { %s1038_s24 = smov 0   ;;  %s1040_s25 = smov 0  }
   0x5 LB: > { %s727_s26 = sadd.s32 4294967295, %s991_s25   ;;  %s728_s27 = sadd.s32 4294967294, %s991_s25   ;;  %s991_s25 = sphi %s1040_s25, %s18_s25   ;;  %s987_s24 = sphi %s1038_s24, %s1269_s24   ;;  %s983_s23 = sphi %s1036_s23, %s1268_s23   ;;  %s979_s22 = sphi %s1034_s22, %s1267_s22   ;;  %s975_s21 = sphi %s1032_s21, %s1266_s21   ;;  %s971_s20 = sphi %s1030_s20, %s1265_s20   ;;  %s967_s19 = sphi %s1028_s19, %s1264_s19   ;;  %s963_s18 = sphi %s1026_s18, %s1263_s18  }
   0x6   : > { %s27_s28 = sadd.s32 1, %s983_s23  ;;  %s30_s29 = sadd.s32 1, %s987_s24 }
   0x7   : > { %p28_p0 = scmp.ge.s32.totalorder %s27_s28, 2  ;;  %p164_p1 = scmp.ne.s32.totalorder %s971_s20, %s967_s19 }
   0x8   : > { %p165_p2 = scmp.eq.s32.totalorder %s727_s26, 3  ;;  %p170_p4 = scmp.ne.s32.totalorder %s967_s19, %s963_s18 }
   0x9   : > { %s1271_s28 = smov (%p28_p0, %s27_s28), 0  ;;  %s1273_s29 = smov (!%p28_p0, %s30_s29), %s987_s24 }
   0xa   : > { %p1075_p3 = por %p165_p2, %p164_p1  ;;  %p32_p5 = scmp.ge.s32.totalorder %s1273_s29, 2 }
   0xb   : > { %p171_p6 = scmp.eq.s32.totalorder %s728_s27, 3  ;;  %p731_p7 = scmp.ge.s32.totalorder %s991_s25, 1 }
   0xc   : > { %p217_p8 = scmp.lt.s32.totalorder %s991_s25, 5  ;;  %s1275_s29 = smov (%p32_p5, %s1273_s29), 0 }
   0xd   : > { %1259 = sst [smem:[#allocation9_spill]] %s1275_s29  ;;  %p1085_p9 = por %p171_p6, %p170_p4 }
   0xe   : > { %p218_p10 = pnand %p731_p7, %p217_p8  ;;  %s151_s7 = ssub.s32 %s987_s24, %s1275_s29 }
   0xf   : > { %s154_s8 = sadd.s32 1, %s971_s20  ;;  %p152_p11 = scmp.eq.s32.totalorder %s151_s7, 0 }
  0x10   : > { %221 = sbr.rel (%p218_p10) target bundleno = 619 (0x26b), region = 40  ;;  %s1256_s10 = sand.u32 (!%p218_p10), 1, %s967_s19  }
  0x11   : > { %s1093_s9 = scalar_select %p152_p11, %s971_s20, %s154_s8  }
  0x12   : > { %s733_s11 = sshll.u32 (!%p218_p10), %s975_s21, 2  ;;  %s1099_s12 = sshll.u32 (!%p218_p10), %s1256_s10, 1 }
  0x13   : > { %p253_p12 = scmp.lt.s32.totalorder (!%p218_p10), %s979_s22, 1  ;;  %p255_p13 = scmp.lt.s32.totalorder (!%p218_p10), %s733_s11, 7 }
  0x14   : > { %s251_s29 = scalar_lea.vmem (!%p218_p10), [#allocation6], %s1099_s12  ;;  %p736_p0 = scmp.ne.s32.totalorder (!%p218_p10), %s975_s21, 0 }
  0x17   : > { %s1103_s13 = scalar_select %p253_p12, %s979_s22, 1 }
  0x18   : > { %s1277_s11 = smov (!%p255_p13, %s733_s11), 7  ;;  %268 = sbr.rel (%p736_p0) target bundleno = 31 (0x1f), region = 44 }
  0x19   : > { %s734_s14 = sshll.u32 %s1103_s13, 3  ;;  %s264_s17 = scalar_lea.vmem %s1252_s2, %s1103_s13  ;;  %vm269_vm0 = vcmask (!%p736_p0), 122880   ;;  %v993_v0 = vmov (!%p736_p0), -inf   ;;  %v994_v1 = vmov (!%p736_p0), 0.0  }
  0x1a   : > { %s258_s26 = sadd.s32 %s734_s14, %s1277_s11  ;;  %270 = vst.msk [vmem:[#allocation2] sm:$0x1] (!%p736_p0), %vm269_vm0, %v993_v0  ;;  %271 = vst.msk [vmem:[#allocation3] sm:$0x1] (!%p736_p0), %vm269_vm0, %v994_v1 }
  0x1b   : > { %s735_s27 = sshll.u32 %s258_s26, 3  ;;  %272 = vst.msk [vmem:[#allocation4] sm:$0x1] (!%p736_p0), %vm269_vm0, %v994_v1  ;;  %273 = vst.msk [vmem:[#allocation5] sm:$0x1] (!%p736_p0), %vm269_vm0, %v994_v1 }
  0x1c   : > { %s260_s10 = scalar_lea.vmem %s1250_s0, %s735_s27 }
  0x1f PF: > { %v278_v2 = vld [vmem:[%s1251_s1] sm:$0xff]  ;;  %v279_v3 = vld [vmem:[%s1251_s1 + $0x8] sm:$0xff]  ;;  %vm287_vm1 = vcmask 130048   ;;  %v1127_v7 = vld [vmem:[%s260_s10 + $0x10] sm:$0xff]  ;;  %vm400_vm2 = vcmask 261120   ;;  %v517_v46 = vlaneseq  ;;  %vm554_vm3 = vcmask 122880  }
  0x20   : > { %v1121_v4 = vld [vmem:[%s260_s10] sm:$0xff]  ;;  %v790_v5 = vpack.c.bf16 %v279_v3, %v278_v2  ;;  %v1125_v6 = vld [vmem:[%s260_s10 + $0x8] sm:$0xff]  ;;  %v1133_v8 = vld [vmem:[%s260_s10 + $0x18] sm:$0xff]  ;;  %p747_p1 = scmp.ne.s32.totalorder %s975_s21, 1 }
  0x21   : > { %770 = vmatprep.mubr.msk.f32.mxu0 %vm287_vm1, %v1121_v4  ;;  %v389_v9 = vld [vmem:[%s1253_s3] sm:$0xff]  ;;  %v390_v10 = vld [vmem:[%s1253_s3 + $0x8] sm:$0xff]  ;;  %v391_v12 = vld [vmem:[%s1253_s3 + $0x10] sm:$0xff]  ;;  %v1161_v49 = vshrl.u32 %v517_v46, 7  ;;  %vm624_vm6 = vcmask (!%p747_p1), 1040384   ;;  %vm626_vm7 = vcmask (!%p747_p1), 123904  }
  0x22   : > { %791 = vmatprep.subr.bf16.mxu0 %v790_v5  ;;  %v794_v11 = vpack.c.bf16 %v390_v10, %v389_v9  ;;  %v392_v13 = vld [vmem:[%s1253_s3 + $0x18] sm:$0xff]  ;;  %v737_v15 = vld [vmem:[%s264_s17] ss:$0 sm:$0xff] }
  0x23   : > { %793 = vmatpush3.bf16.msra.mxu0 %v790_v5  ;;  %v798_v14 = vpack.c.bf16 %v392_v13, %v391_v12  ;;  %v742_v28 = vld [vmem:[%s1254_s4] ss:$0 sm:$0xff]  ;;  %v519_v53 = vsub.s32 0, %v1161_v49 }
  0x24   : > { %795 = vmatprep.subr.bf16.mxu1 %v794_v11  ;;  %v511_v51 = vld [vmem:[#allocation2] sm:$0x1] }
  0x25   : > { %797 = vmatpush3.bf16.msra.mxu1 %v794_v11 }
  0x26   : > { %771 = vmatmul.mubr.msk.f32.vlgmr.msra.gmra.mrb[0].mxu0 %vm287_vm1, %v1125_v6  ;;  %799 = vmatprep.subr.bf16.mxu1 %v798_v14 }
  0x27   : > { %773 = vmatprep.mubr.msk.f32.mxu0 %vm287_vm1, %v1127_v7 }
  0x29   : > { %801 = vmatpush3.bf16.msra.mxu1 %v798_v14 }
  0x2a   : > { %774 = vmatmul.mubr.msk.f32.gmra.mrb[2].mxu0 %vm287_vm1, %v1133_v8 }
  0xf9   : > { %v772_v16 = vpop.f32.mrb[0].mxu0 }
  0xfa   : > { %v372_v17 = vadd.f32 %v772_v16, %v737_v15  ;;  %v366_v18 = vpop.f32.mrb[1].mxu0 }
  0xfb   : > { %v367_v19 = vadd.f32 %v737_v15, %v366_v18 }
  0xfd   : > { %875 = vtanh.f32 %v367_v19  ;;  %v775_v20 = vpop.f32.mrb[2].mxu0 }
  0xfe   : > { %877 = vtanh.f32 %v372_v17  ;;  %v382_v21 = vadd.f32 %v775_v20, %v737_v15  ;;  %v376_v22 = vpop.f32.mrb[3].mxu0 }
  0xff   : > { %v377_v23 = vadd.f32 %v737_v15, %v376_v22 }
 0x101   : > { %879 = vtanh.f32 %v377_v23 }
 0x102   : > { %881 = vtanh.f32 %v382_v21 }
 0x107   : > { %v876_v24 = vpop.eup %875 }
 0x108   : > { %v878_v25 = vpop.eup %877  ;;  %784 = vmatprep.mubr.msk.f32.mxu1 %vm400_vm2, %v876_v24 }
 0x109   : > { %785 = vmatmul.mubr.msk.f32.vlgmr.msra.gmra.mrb[0].mxu1 %vm400_vm2, %v878_v25 }
 0x10b   : > { %v880_v26 = vpop.eup %879 }
 0x10c   : > { %v882_v27 = vpop.eup %881  ;;  %787 = vmatprep.mubr.msk.f32.mxu1 %vm400_vm2, %v880_v26 }
 0x10d   : > { %788 = vmatmul.mubr.msk.f32.gmra.mrb[2].mxu1 %vm400_vm2, %v882_v27 }
 0x1dc   : > { %v786_v29 = vpop.f32.mrb[0].mxu1 }
 0x1dd   : > { %v485_v30 = vadd.f32 %v786_v29, %v742_v28  ;;  %v479_v31 = vpop.f32.mrb[1].mxu1 }
 0x1de   : > { %v480_v32 = vadd.f32 %v742_v28, %v479_v31 }
 0x1df   : > { %v499_v33 = vsel %vm287_vm1, %v485_v30, -inf }
 0x1e0   : > { %v498_v34 = vsel %vm287_vm1, %v480_v32, -inf  ;;  %v789_v35 = vpop.f32.mrb[2].mxu1 }
 0x1e1   : > { %v502_v36 = vmax.f32 %v498_v34, %v499_v33  ;;  %v495_v37 = vadd.f32 %v789_v35, %v742_v28  ;;  %v489_v38 = vpop.f32.mrb[3].mxu1 }
 0x1e2   : > { %v490_v39 = vadd.f32 %v742_v28, %v489_v38 }
 0x1e3   : > { %v501_v40 = vsel %vm287_vm1, %v495_v37, -inf }
 0x1e4   : > { %v500_v41 = vsel %vm287_vm1, %v490_v39, -inf }
 0x1e5   : > { %v503_v42 = vmax.f32 %v500_v41, %v501_v40 }
 0x1e7   : > { %v504_v43 = vmax.f32 %v502_v36, %v503_v42 }
 0x1e9   : > { %v505_v44 = vrot.slane %v504_v43, 4 }
 0x1eb   : > { %v506_v45 = vmax.f32 %v504_v43, %v505_v44  ;;  %v538_v44 = vld [vmem:[#allocation3] sm:$0x1] }
 0x1ed   : > { %v507_v47 = vrot.slane %v506_v45, 2 }
 0x1ef   : > { %v508_v48 = vmax.f32 %v506_v45, %v507_v47 }
 0x1f1   : > { %v509_v50 = vrot.slane %v508_v48, 1 }
 0x1f3   : > { %v510_v52 = vmax.f32 %v508_v48, %v509_v50  ;;  %v556_v48 = vld [vmem:[#allocation4] sm:$0x1] }
 0x1f5   : > { %v512_v54 = vmax.f32 %v511_v51, %v510_v52 }
 0x1f7   : > { %v520_v55 = vrot.slane %v512_v54, %v519_v53  ;;  %594 = vst.msk [vmem:[#allocation2] sm:$0x1] %vm554_vm3, %v512_v54  ;;  %v513_v0 = vsub.f32 %v511_v51, %v512_v54 }
 0x1f9   : > { %v522_v56 = vsub.f32 %v480_v32, %v520_v55  ;;  %v523_v57 = vsub.f32 %v485_v30, %v520_v55  ;;  %v524_v58 = vsub.f32 %v490_v39, %v520_v55  ;;  %v525_v59 = vsub.f32 %v495_v37, %v520_v55 }
 0x1fa   : > { %v514_v3 = vmul.f32 1.442695, %v513_v0 }
 0x1fb   : > { %v526_v60 = vmul.f32 1.442695, %v522_v56  ;;  %v528_v61 = vmul.f32 1.442695, %v523_v57  ;;  %v530_v62 = vmul.f32 1.442695, %v524_v58 }
 0x1fc   : > { %v532_v63 = vmul.f32 1.442695, %v525_v59  ;;  %v573_v59 = vld [vmem:[#allocation5] sm:$0x1] }
 0x1fd   : > { %883 = vpow2.f32 %v526_v60 }
 0x1fe   : > { %885 = vpow2.f32 %v528_v61 }
 0x1ff   : > { %887 = vpow2.f32 %v530_v62 }
 0x200   : > { %889 = vpow2.f32 %v532_v63 }
 0x201   : > { %891 = vpow2.f32 %v514_v3 }
 0x207   : > { %v884_v1 = vpop.eup %883 }
 0x208   : > { %v886_v2 = vpop.eup %885  ;;  %v534_v5 = vmul.f32 %v884_v1, %v1121_v4  ;;  %v540_v9 = vsel %vm287_vm1, %v884_v1, 0.0 }
 0x209   : > { %v888_v10 = vpop.eup %887  ;;  %v535_v11 = vmul.f32 %v886_v2, %v1125_v6  ;;  %v541_v12 = vsel %vm287_vm1, %v886_v2, 0.0 }
 0x20a   : > { %v890_v13 = vpop.eup %889  ;;  %v536_v14 = vmul.f32 %v888_v10, %v1127_v7  ;;  %v542_v15 = vadd.f32 %v541_v12, %v540_v9  ;;  %v558_v16 = vsel %vm287_vm1, %v534_v5, 0.0  ;;  %v543_v18 = vsel %vm287_vm1, %v888_v10, 0.0 }
 0x20b   : > { %v537_v17 = vmul.f32 %v890_v13, %v1133_v8  ;;  %v559_v19 = vsel %vm287_vm1, %v535_v11, 0.0  ;;  %v575_v20 = vmul.f32 %v534_v5, %v1121_v4  ;;  %v576_v23 = vmul.f32 %v535_v11, %v1125_v6  ;;  %v892_v42 = vpop.eup %891 }
 0x20c   : > { %v544_v21 = vadd.f32 %v543_v18, %v542_v15  ;;  %v560_v22 = vadd.f32 %v559_v19, %v558_v16  ;;  %v545_v24 = vsel %vm287_vm1, %v890_v13, 0.0  ;;  %v561_v25 = vsel %vm287_vm1, %v536_v14, 0.0 }
 0x20d   : > { %v577_v26 = vmul.f32 %v536_v14, %v1127_v7  ;;  %v579_v27 = vsel %vm287_vm1, %v575_v20, 0.0  ;;  %v578_v30 = vmul.f32 %v537_v17, %v1133_v8  ;;  %v580_v31 = vsel %vm287_vm1, %v576_v23, 0.0 }
 0x20e   : > { %v546_v28 = vadd.f32 %v545_v24, %v544_v21  ;;  %v562_v29 = vadd.f32 %v561_v25, %v560_v22  ;;  %v563_v4 = vsel %vm287_vm1, %v537_v17, 0.0  ;;  %v581_v32 = vadd.f32 %v580_v31, %v579_v27 }
 0x20f   : > { %v582_v6 = vsel %vm287_vm1, %v577_v26, 0.0  ;;  %v584_v7 = vsel %vm287_vm1, %v578_v30, 0.0  ;;  %v539_v51 = vmul.f32 %v892_v42, %v538_v44  ;;  %v557_v57 = vmul.f32 %v892_v42, %v556_v48 }
 0x210   : > { %v547_v33 = vrot.slane %v546_v28, 4  ;;  %v564_v34 = vadd.f32 %v563_v4, %v562_v29  ;;  %v583_v35 = vadd.f32 %v582_v6, %v581_v32  ;;  %v574_v62 = vmul.f32 %v892_v42, %v573_v59 }
 0x212   : > { %v548_v36 = vadd.f32 %v547_v33, %v546_v28  ;;  %v565_v37 = vrot.slane %v564_v34, 4  ;;  %v585_v38 = vadd.f32 %v584_v7, %v583_v35 }
 0x214   : > { %v549_v39 = vrot.slane %v548_v36, 2  ;;  %v566_v40 = vadd.f32 %v565_v37, %v564_v34  ;;  %v586_v41 = vrot.slane %v585_v38, 4 }
 0x216   : > { %v550_v8 = vadd.f32 %v549_v39, %v548_v36  ;;  %v567_v43 = vrot.slane %v566_v40, 2  ;;  %v587_v45 = vadd.f32 %v586_v41, %v585_v38 }
 0x218   : > { %v551_v46 = vrot.slane %v550_v8, 1  ;;  %v568_v47 = vadd.f32 %v567_v43, %v566_v40  ;;  %v588_v50 = vrot.slane %v587_v45, 2 }
 0x21a   : > { %v552_v52 = vadd.f32 %v551_v46, %v550_v8  ;;  %v569_v54 = vrot.slane %v568_v47, 1  ;;  %v589_v55 = vadd.f32 %v588_v50, %v587_v45 }
 0x21c   : > { %v553_v56 = vadd.f32 %v552_v52, %v539_v51  ;;  %v570_v58 = vadd.f32 %v569_v54, %v568_v47  ;;  %v590_v60 = vrot.slane %v589_v55, 1  ;;  %598 = sbr.rel (%p747_p1) target bundleno = 594 (0x252), region = 48 }
 0x21e   : > { %555 = vst.msk [vmem:[#allocation3] sm:$0x1] %vm554_vm3, %v553_v56  ;;  %v571_v61 = vadd.f32 %v570_v58, %v557_v57  ;;  %v591_v63 = vadd.f32 %v590_v60, %v589_v55 }
 0x220   : > { %572 = vst.msk [vmem:[#allocation4] sm:$0x1] %vm554_vm3, %v571_v61  ;;  %v592_v0 = vadd.f32 %v591_v63, %v574_v62 }
 0x222   : > { %593 = vst.msk [vmem:[#allocation5] sm:$0x1] %vm554_vm3, %v592_v0 }
 0x225   : > { %v599_v1 = vld [vmem:[#allocation3] sm:$0x1] }
 0x226   : > { %893 = vrcp.f32 %v599_v1 }
 0x227   : > { %v604_v9 = vld [vmem:[#allocation4] sm:$0x1] }
 0x229   : > { %v606_v10 = vld [vmem:[#allocation5] sm:$0x1] }
 0x230   : > { %v894_v2 = vpop.eup %893 }
 0x231   : > { %v601_v3 = vmul.f32 %v894_v2, %v599_v1 }
 0x233   : > { %v602_v5 = vsub.f32 2.0, %v601_v3 }
 0x235   : > { %v603_v11 = vmul.f32 %v894_v2, %v602_v5 }
 0x237   : > { %v605_v12 = vmul.f32 %v604_v9, %v603_v11  ;;  %v607_v13 = vmul.f32 %v606_v10, %v603_v11 }
 0x239   : > { %v608_v14 = vmul.f32 %v605_v12, %v605_v12 }
 0x23b   : > { %v609_v15 = vsub.f32 %v607_v13, %v608_v14 }
 0x23d   : > { %v610_v16 = vmax.f32 %v609_v15, 1e-09 }
 0x23f   : > { %895 = vrsqrt.f32 %v610_v16  ;;  %vm613_vm4 = vcmp.eq.f32.partialorder %v610_v16, inf  ;;  %v616_v18 = vand.u32 2147483648, %v610_v16  ;;  %vm615_vm5 = vcmp.eq.f32.partialorder %v610_v16, 0.0 }
 0x249   : > { %v896_v17 = vpop.eup %895 }
 0x24a   : > { %v612_v19 = vmul.f32 %v896_v17, %v610_v16 }
 0x24c   : > { %v614_v20 = vsel %vm613_vm4, %v610_v16, %v612_v19 }
 0x24d   : > { %v617_v21 = vsel %vm615_vm5, %v616_v18, %v614_v20 }
 0x24e   : > { %v622_v22 = vrot.slane %v617_v21, %v519_v53 }
 0x250   : > { %v625_v23 = vsel %vm624_vm6, %v605_v12, %v622_v22 }
 0x251   : > { %627 = vst.msk [vmem:[%s251_s29] sm:$0x3] %vm626_vm7, %v625_v23 }
 0x252 PF: > { %s749_s21 = sshll.u32 %s979_s22, 5  ;;  %s642_s15 = sshll.u32 %s251_s29, 4  ;;  %s643_s15 = int_to_ptr.vmem [resolvable:$true] %s642_s15 }
 0x253   : > { %s1199_s8 = scalar_lea.hbm %s1255_s5, %s749_s21  ;;  %s1261_s16 = sand.u32 1, %s967_s19  }
 0x254   : > { %s629_s11 = scalar_lea.sflag [#allocation7], %s1261_s16  ;;  %s897_s10 = scalar_lea.vmem %s643_s15, 32 }
 0x255   : > { %p898_p2 = scmp.ne.s32.totalorder %s643_s15, %s897_s10  ;;  %s995_s14 = smov [#allocation6]  }
 0x256   : > { %s901_s26 = sshll.u32 %s995_s14, 4  ;;  %s902_s26 = int_to_ptr.vmem [resolvable:$false] %s901_s26 }
 0x257   : > { %p899_p4 = pnand %p898_p2, %p1075_p3  ;;  %s903_s13 = scalar_lea.vmem %s902_s26, 64 }
 0x258   : > { %p904_p6 = scmp.lt.s32.totalorder %s643_s15, %s902_s26  ;;  %p905_p7 = scmp.lt.s32.totalorder %s903_s13, %s897_s10 }
 0x259   : > { %p900_p5 = pneg %p899_p4 }
 0x25a   : > { %p906_p8 = por %p905_p7, %p904_p6 }
 0x25c   : > { %p907_p10 = pnand %p906_p8, %p900_p5 }
 0x25e   : > { %910 = shalt.err (!%p907_p10)
}
 0x25f   : > { %s911_s22 = scalar_lea.hbm %s1199_s8, 32  ;;  %s915_s17 = scalar_lea.hbm %s1255_s5, 64 }
 0x260   : > { %p912_p11 = scmp.ne.s32.totalorder %s1199_s8, %s911_s22  ;;  %p916_p0 = scmp.lt.u32.totalorder %s1199_s8, %s1255_s5 }
 0x261   : > { %p917_p1 = scmp.lt.u32.totalorder %s915_s17, %s911_s22  ;;  %p919_p4 = scmp.lt.u32.totalorder %s911_s22, %s1199_s8 }
 0x262   : > { %p913_p12 = pnand %p912_p11, %p1075_p3 }
 0x263   : > { %p918_p2 = por %p917_p1, %p916_p0 }
 0x264   : > { %p914_p13 = pneg %p913_p12 }
 0x265   : > { %p920_p5 = por %p919_p4, %p918_p2 }
 0x267   : > { %p921_p6 = pnand %p920_p5, %p914_p13 }
 0x269   : > { %924 = shalt.err (!%p921_p6)
}
 0x26a   : > { %802 = dma.vmem_to_hbm [thread:$0]  (%p1075_p3), %s643_s15, 32, %s1199_s8, %s629_s11  }
 0x26b PF: > { %p808_p7 = scmp.ge.s32.totalorder %s991_s25, 2  ;;  %s654_s7 = sand.u32 1, %s963_s18  }
 0x26c   : > { %s655_s16 = scalar_lea.sflag [#allocation7], %s654_s7 }
 0x26d   : > { %p805_p8 = pnand %p808_p7, %p1085_p9 }
 0x26f   : > { %958 = dma.done.wait (!%p805_p8), %s655_s16, 32  }
 0x270   : > { %960 = vsyncadd (!%p805_p8), %s655_s16, 4294967264  ;;  %s18_s25 = sadd.s32 1, %s991_s25   ;;  %s1262_s30 = sld [smem:[#allocation9_spill]] }
 0x271   : > { %p15_p10 = scmp.ge.s32.totalorder %s18_s25, 6   ;;  %s1263_s18 = smov %s967_s19 }
 0x272   : > { %s1264_s19 = smov %s971_s20  ;;  %s1265_s20 = smov %s1093_s9 }
 0x273   : > { %s1266_s21 = smov %s983_s23  ;;  %s1267_s22 = smov %s987_s24 }
 0x274   : > { %s1268_s23 = smov %s1271_s28  ;;  %17 = sbr.rel (!%p15_p10) target bundleno = 5 (0x5), region = 86 }
 0x276   : > { %s1269_s24 = smov %s1262_s30 }
 0x27b   :  { %660 = vsyncpa [#allocation7], 1 }
 0x27c   :  { %662 = vsyncpa [#allocation7 + $0x1], 1 }

</bundles_post_ra>
